<compile_context>
chip_gen: v6e
topology: v6e:2x2x1
jax: 0.10.0
libtpu: 0.0.40
codegen_flags: <defaults>
</compile_context>

<pallas_src>
import functools
from typing import NamedTuple

import jax
import jax.numpy as jnp
from jax.experimental import pallas as pl
from jax.experimental.pallas import tpu as pltpu

_LANE = 128      # hidden width padded to a multiple of this (lane dim)
_SUBLANE = 16    # batch-tile granularity (bf16 sublane packing; also valid for f32)


def _round_up(x, m):
    return (x + m - 1) // m * m


def _tpu_generation():
    """Best-effort TPU generation (4/5/6/7; 0 if unknown)."""
    try:
        kind = jax.devices()[0].device_kind.lower()
    except Exception:           # no devices / unusual backend -> conservative defaults
        return 0
    for token, gen in (("v7", 7), ("tpu7", 7), ("v6", 6), ("tpu6", 6),
                       ("v5", 5), ("v4", 4)):
        if token in kind:
            return gen
    return 0


def _vmem_budget_bytes(gen):
    """Usable vmem_limit_bytes budget for this generation."""
    try:
        cap = int(pltpu.get_tpu_info().vmem_capacity_bytes)
        return max(cap - (8 << 20), 32 << 20)   # leave headroom below physical
    except Exception:
        pass
    if gen >= 7:
        return 56 << 20        # v7x: 64 MiB physical per TensorCore
    if gen in (5, 6):
        return 100 << 20       # v5e / v6e: 128 MiB physical
    return 64 << 20


class PreparedParams(NamedTuple):
    w_in: jax.Array     # (dim, nunit_p)             compute dtype
    b_in: jax.Array     # (1, nunit_p)               f32
    w_hid: jax.Array    # (nlayer, nunit_p, nunit_p) compute dtype
    b_hid: jax.Array    # (nlayer, 1, nunit_p)       f32
    w_out: jax.Array    # (nunit_p, dim)             compute dtype
    b_out: jax.Array    # (1, dim)                   f32
    dim: int
    nunit: int
    nlayer: int


def prepare_params(params, compute_dtype=jnp.bfloat16):
    """Lane-pad the hidden width and cast weights ONCE; reuse across RHS evals.

    Padded weight rows/cols and padded bias lanes are zero and tanh(0) == 0, so
    padded lanes stay exactly zero and never leak into the real outputs.
    """
    w_in, b_in, w_hid, b_hid, w_out, b_out = params
    dim, nunit = w_in.shape
    nlayer = w_hid.shape[0]
    nunit_p = _round_up(nunit, _LANE)
    pad_u = nunit_p - nunit
    cd, f32 = compute_dtype, jnp.float32
    return PreparedParams(
        w_in=jnp.pad(w_in, ((0, 0), (0, pad_u))).astype(cd),
        b_in=jnp.pad(jnp.reshape(b_in, (1, nunit)), ((0, 0), (0, pad_u))).astype(f32),
        w_hid=jnp.pad(w_hid, ((0, 0), (0, pad_u), (0, pad_u))).astype(cd),
        b_hid=jnp.pad(jnp.reshape(b_hid, (nlayer, 1, nunit)),
                      ((0, 0), (0, 0), (0, pad_u))).astype(f32),
        w_out=jnp.pad(w_out, ((0, pad_u), (0, 0))).astype(cd),
        b_out=jnp.reshape(b_out, (1, dim)).astype(f32),
        dim=int(dim), nunit=int(nunit), nlayer=int(nlayer))


def _mlp_kernel(y_ref, w_in_ref, b_in_ref, w_hid_ref, b_hid_ref,
                w_out_ref, b_out_ref, o_ref, *, nlayer, compute_dtype, tanh_dtype):
    cd = compute_dtype
    # Input projection: (TB, dim) @ (dim, nunit_p) + (1, nunit_p); f32 accumulate.
    h = jnp.dot(y_ref[...].astype(cd), w_in_ref[...],
                preferred_element_type=jnp.float32) + b_in_ref[...]
    # Hidden layers: Tanh -> Linear(nunit, nunit). Static Python unroll (nlayer
    # is a Python int) so EUP tanh overlaps MXU matmuls.
    for i in range(nlayer):
        a = jnp.tanh(h.astype(tanh_dtype)).astype(cd)
        h = jnp.dot(a, w_hid_ref[i],
                    preferred_element_type=jnp.float32) + b_hid_ref[i]
    # Output projection: Tanh -> Linear(nunit, dim)
    a = jnp.tanh(h.astype(tanh_dtype)).astype(cd)
    out = jnp.dot(a, w_out_ref[...],
                  preferred_element_type=jnp.float32) + b_out_ref[...]
    o_ref[...] = out.astype(o_ref.dtype)


def odefunc_forward(t, y, prepared, *, tile_b=None):
    """Pallas forward of ODEfunc.forward(t, y). `t` is unused (as in PyTorch).

    `prepared` must come from prepare_params() so weight padding / casting is
    amortized over the many RHS evaluations of an ODE solver.
    """
    del t
    B, dim = y.shape
    assert dim == prepared.dim, "y feature dim does not match prepared params"
    nlayer, nunit_p = prepared.nlayer, prepared.w_in.shape[1]
    cd = prepared.w_in.dtype
    cd_bytes = jnp.dtype(cd).itemsize

    gen = _tpu_generation()
    # tanh in bf16 on v6e/v7x (bf16 EUP/VPU); f32 tanh on v5e or for f32 compute.
    tanh_dtype = cd if (jnp.dtype(cd) == jnp.dtype(jnp.bfloat16) and gen >= 6) \
        else jnp.float32

    # ---- batch tiling (MXU M dimension) -----------------------------------
    if tile_b is None:
        max_tile = 2048 if (gen == 6 and nunit_p <= 256) else 512
        if gen >= 7:
            # v7x has 2 TensorCores: aim for >= 2 "parallel" grid steps.
            tile_b = min(_round_up(pl.cdiv(B, 2), _SUBLANE), max_tile)
        else:
            # 1 TC: a single big tile avoids per-step pipeline overhead.
            tile_b = min(_round_up(B, _SUBLANE), max_tile)
    tile_b = _round_up(tile_b, _SUBLANE)
    B_p = _round_up(B, tile_b)
    grid = (B_p // tile_b,)

    # Only the batch axis is padded (often a no-op); the feature dim keeps its
    # true width so input/output HBM traffic is not inflated 16x.
    y_p = jnp.pad(y, ((0, B_p - B), (0, 0))) if B_p != B else y

    # ---- explicit VMEM budget ----------------------------------------------
    weight_bytes = (dim * nunit_p + nlayer * nunit_p * nunit_p + nunit_p * dim) * cd_bytes
    bias_bytes = ((nlayer + 1) * nunit_p + dim) * 4
    io_bytes = 4 * tile_b * dim * y.dtype.itemsize          # double-buffered y in + out
    act_bytes = (2 * 4 + cd_bytes + 4) * tile_b * nunit_p   # live f32 h, cd a, staging
    vmem_limit = int(min(
        max(2 * (weight_bytes + bias_bytes) + io_bytes + act_bytes + (8 << 20), 16 << 20),
        _vmem_budget_bytes(gen)))

    kernel = functools.partial(_mlp_kernel, nlayer=nlayer,
                               compute_dtype=cd, tanh_dtype=tanh_dtype)

    out_p = pl.pallas_call(
        kernel,
        out_shape=jax.ShapeDtypeStruct((B_p, dim), y.dtype),
        grid_spec=pltpu.PrefetchScalarGridSpec(
            num_scalar_prefetch=0,
            grid=grid,
            in_specs=[
                pl.BlockSpec((tile_b, dim), lambda i: (i, 0)),                  # y tile
                pl.BlockSpec((dim, nunit_p), lambda i: (0, 0)),                 # w_in
                pl.BlockSpec((1, nunit_p), lambda i: (0, 0)),                   # b_in
                pl.BlockSpec((nlayer, nunit_p, nunit_p), lambda i: (0, 0, 0)),  # w_hid
                pl.BlockSpec((nlayer, 1, nunit_p), lambda i: (0, 0, 0)),        # b_hid
                pl.BlockSpec((nunit_p, dim), lambda i: (0, 0)),                 # w_out
                pl.BlockSpec((1, dim), lambda i: (0, 0)),                       # b_out
            ],
            out_specs=pl.BlockSpec((tile_b, dim), lambda i: (i, 0)),
        ),
        compiler_params=pltpu.CompilerParams(
            dimension_semantics=("parallel",),
            vmem_limit_bytes=vmem_limit),
    )(y_p, prepared.w_in, prepared.b_in, prepared.w_hid, prepared.b_hid,
      prepared.w_out, prepared.b_out)

    return out_p if B_p == B else out_p[:B]


def init_params(key, dim, nlayer, nunit, dtype=jnp.float32):
    """Deterministic init mimicking nn.Linear (uniform +/- 1/sqrt(fan_in))."""
    ks = jax.random.split(key, 6)

    def unif(k, shape, fan_in):
        bound = 1.0 / jnp.sqrt(jnp.asarray(fan_in, dtype))
        return jax.random.uniform(k, shape, dtype, -bound, bound)

    w_in = unif(ks[0], (dim, nunit), dim)
    b_in = unif(ks[1], (1, nunit), dim)
    w_hid = unif(ks[2], (nlayer, nunit, nunit), nunit)
    b_hid = unif(ks[3], (nlayer, 1, nunit), nunit)
    w_out = unif(ks[4], (nunit, dim), nunit)
    b_out = unif(ks[5], (1, dim), nunit)
    return (w_in, b_in, w_hid, b_hid, w_out, b_out)


def odefunc_reference(t, y, params):
    """Plain-JAX f32 reference of the same MLP (correctness check)."""
    del t
    w_in, b_in, w_hid, b_hid, w_out, b_out = params
    h = y @ w_in + b_in
    for i in range(w_hid.shape[0]):
        h = jnp.tanh(h) @ w_hid[i] + b_hid[i]
    return jnp.tanh(h) @ w_out + b_out


if __name__ == "__main__":
    # Small, module-consistent shapes: y is (batch, dim).
    dim, nlayer, nunit = 8, 2, 32
    batch = 16

    key = jax.random.PRNGKey(0)
    k_y, k_p = jax.random.split(key)
    y = jax.random.normal(k_y, (batch, dim), jnp.float32)
    t = jnp.float32(0.0)   # unused by forward, kept for interface parity
    params = init_params(k_p, dim, nlayer, nunit)

    ref = odefunc_reference(t, y, params)

    # f32 compute path: tight check against the reference.
    prep_f32 = prepare_params(params, compute_dtype=jnp.float32)
    out_f32 = jax.block_until_ready(odefunc_forward(t, y, prep_f32))
    assert out_f32.shape == (batch, dim)
    assert jnp.allclose(out_f32, ref, atol=1e-5, rtol=1e-5), "f32 mismatch vs reference"

    # Default bf16-on-MXU path (f32 accumulation): looser tolerance.
    prep_bf16 = prepare_params(params)   # pad + cast ONCE, reused for every RHS eval
    out_bf16 = jax.block_until_ready(odefunc_forward(t, y, prep_bf16))
    assert out_bf16.shape == (batch, dim)
    assert jnp.allclose(out_bf16, ref, atol=1e-1, rtol=5e-2), "bf16 mismatch vs reference"

    # Second call reuses the prepared weights (the amortization an ODE solver gets).
    out_bf16_2 = jax.block_until_ready(odefunc_forward(t, y, prep_bf16))
    assert jnp.allclose(out_bf16, out_bf16_2), "non-deterministic across calls"

    print("KERNEL_OK")
</pallas_src>

<mosaic_0001>
module attributes {stable_mosaic.version = 11 : i64} {
  func.func @_mlp_kernel(%arg0: i32, %arg1: memref<16x8xf32, #tpu.memory_space<vmem>>, %arg2: memref<8x128xf32, #tpu.memory_space<vmem>>, %arg3: memref<1x128xf32, #tpu.memory_space<vmem>>, %arg4: memref<2x128x128xf32, #tpu.memory_space<vmem>>, %arg5: memref<2x1x128xf32, #tpu.memory_space<vmem>>, %arg6: memref<128x8xf32, #tpu.memory_space<vmem>>, %arg7: memref<1x8xf32, #tpu.memory_space<vmem>>, %arg8: memref<16x8xf32, #tpu.memory_space<vmem>>) attributes {dimension_semantics = [#tpu.dimension_semantics<parallel>], iteration_bounds = array<i64: 1>, scalar_prefetch = 0 : i64, scratch_operands = 0 : i64, tpu.core_type = #tpu.core_type<tc>, window_params = [{transform_indices = @transform_0, window_bounds = array<i64: 16, 8>}, {pipeline_mode = #tpu.pipeline_mode<synchronous>, transform_indices = @transform_1, window_bounds = array<i64: 8, 128>}, {pipeline_mode = #tpu.pipeline_mode<synchronous>, transform_indices = @transform_2, window_bounds = array<i64: 1, 128>}, {pipeline_mode = #tpu.pipeline_mode<synchronous>, transform_indices = @transform_3, window_bounds = array<i64: 2, 128, 128>}, {pipeline_mode = #tpu.pipeline_mode<synchronous>, transform_indices = @transform_4, window_bounds = array<i64: 2, 1, 128>}, {pipeline_mode = #tpu.pipeline_mode<synchronous>, transform_indices = @transform_5, window_bounds = array<i64: 128, 8>}, {pipeline_mode = #tpu.pipeline_mode<synchronous>, transform_indices = @transform_6, window_bounds = array<i64: 1, 8>}, {transform_indices = @transform_7, window_bounds = array<i64: 16, 8>}]} {
    %c0 = arith.constant 0 : index
    %c0_0 = arith.constant 0 : index
    %0 = vector.load %arg1[%c0, %c0_0] : memref<16x8xf32, #tpu.memory_space<vmem>>, vector<16x8xf32>
    %c0_1 = arith.constant 0 : index
    %c0_2 = arith.constant 0 : index
    %1 = vector.load %arg2[%c0_1, %c0_2] : memref<8x128xf32, #tpu.memory_space<vmem>>, vector<8x128xf32>
    %cst = arith.constant dense<0.000000e+00> : vector<16x128xf32>
    %2 = tpu.matmul %0, %1, %cst {dimension_numbers = #tpu.dot_dimension_numbers<[1], [0], [0], [1], [0, 0, 1, 1], [], []>} : vector<16x8xf32>, vector<8x128xf32>, vector<16x128xf32> -> vector<16x128xf32>
    %c0_3 = arith.constant 0 : index
    %c0_4 = arith.constant 0 : index
    %3 = vector.load %arg3[%c0_3, %c0_4] : memref<1x128xf32, #tpu.memory_space<vmem>>, vector<1x128xf32>
    %4 = vector.broadcast %3 : vector<1x128xf32> to vector<16x128xf32>
    %5 = arith.addf %2, %4 : vector<16x128xf32>
    %6 = math.tanh %5 : vector<16x128xf32>
    %c0_5 = arith.constant 0 : index
    %c0_6 = arith.constant 0 : index
    %c0_7 = arith.constant 0 : index
    %7 = vector.load %arg4[%c0_5, %c0_6, %c0_7] : memref<2x128x128xf32, #tpu.memory_space<vmem>>, vector<1x128x128xf32>
    %8 = vector.shape_cast %7 : vector<1x128x128xf32> to vector<128x128xf32>
    %cst_8 = arith.constant dense<0.000000e+00> : vector<16x128xf32>
    %9 = tpu.matmul %6, %8, %cst_8 {dimension_numbers = #tpu.dot_dimension_numbers<[1], [0], [0], [1], [0, 0, 1, 1], [], []>} : vector<16x128xf32>, vector<128x128xf32>, vector<16x128xf32> -> vector<16x128xf32>
    %c0_9 = arith.constant 0 : index
    %c0_10 = arith.constant 0 : index
    %c0_11 = arith.constant 0 : index
    %10 = vector.load %arg5[%c0_9, %c0_10, %c0_11] : memref<2x1x128xf32, #tpu.memory_space<vmem>>, vector<1x1x128xf32>
    %11 = vector.shape_cast %10 : vector<1x1x128xf32> to vector<1x128xf32>
    %12 = vector.broadcast %11 : vector<1x128xf32> to vector<16x128xf32>
    %13 = arith.addf %9, %12 : vector<16x128xf32>
    %14 = math.tanh %13 : vector<16x128xf32>
    %c1 = arith.constant 1 : index
    %c0_12 = arith.constant 0 : index
    %c0_13 = arith.constant 0 : index
    %15 = vector.load %arg4[%c1, %c0_12, %c0_13] : memref<2x128x128xf32, #tpu.memory_space<vmem>>, vector<1x128x128xf32>
    %16 = vector.shape_cast %15 : vector<1x128x128xf32> to vector<128x128xf32>
    %cst_14 = arith.constant dense<0.000000e+00> : vector<16x128xf32>
    %17 = tpu.matmul %14, %16, %cst_14 {dimension_numbers = #tpu.dot_dimension_numbers<[1], [0], [0], [1], [0, 0, 1, 1], [], []>} : vector<16x128xf32>, vector<128x128xf32>, vector<16x128xf32> -> vector<16x128xf32>
    %c1_15 = arith.constant 1 : index
    %c0_16 = arith.constant 0 : index
    %c0_17 = arith.constant 0 : index
    %18 = vector.load %arg5[%c1_15, %c0_16, %c0_17] : memref<2x1x128xf32, #tpu.memory_space<vmem>>, vector<1x1x128xf32>
    %19 = vector.shape_cast %18 : vector<1x1x128xf32> to vector<1x128xf32>
    %20 = vector.broadcast %19 : vector<1x128xf32> to vector<16x128xf32>
    %21 = arith.addf %17, %20 : vector<16x128xf32>
    %22 = math.tanh %21 : vector<16x128xf32>
    %c0_18 = arith.constant 0 : index
    %c0_19 = arith.constant 0 : index
    %23 = vector.load %arg6[%c0_18, %c0_19] : memref<128x8xf32, #tpu.memory_space<vmem>>, vector<128x8xf32>
    %cst_20 = arith.constant dense<0.000000e+00> : vector<16x8xf32>
    %24 = tpu.matmul %22, %23, %cst_20 {dimension_numbers = #tpu.dot_dimension_numbers<[1], [0], [0], [1], [0, 0, 1, 1], [], []>} : vector<16x128xf32>, vector<128x8xf32>, vector<16x8xf32> -> vector<16x8xf32>
    %c0_21 = arith.constant 0 : index
    %c0_22 = arith.constant 0 : index
    %25 = vector.load %arg7[%c0_21, %c0_22] : memref<1x8xf32, #tpu.memory_space<vmem>>, vector<1x8xf32>
    %26 = vector.broadcast %25 : vector<1x8xf32> to vector<16x8xf32>
    %27 = arith.addf %24, %26 : vector<16x8xf32>
    %c0_23 = arith.constant 0 : index
    %c0_24 = arith.constant 0 : index
    %28 = vector.load %arg8[%c0_23, %c0_24] : memref<16x8xf32, #tpu.memory_space<vmem>>, vector<16x8xf32>
    tpu.vector_store %arg8[%c0_23, %c0_24], %27 {strides = array<i32>} : memref<16x8xf32, #tpu.memory_space<vmem>>, vector<16x8xf32>,
    return
  }
  func.func @transform_0(%arg0: i32) -> (i32, i32) {
    %c0_i32 = arith.constant 0 : i32
    %c0_i32_0 = arith.constant 0 : i32
    return %arg0, %c0_i32 : i32, i32
  }
  func.func @transform_1(%arg0: i32) -> (i32, i32) {
    %c0_i32 = arith.constant 0 : i32
    %c0_i32_0 = arith.constant 0 : i32
    %c0_i32_1 = arith.constant 0 : i32
    return %c0_i32, %c0_i32_0 : i32, i32
  }
  func.func @transform_2(%arg0: i32) -> (i32, i32) {
    %c0_i32 = arith.constant 0 : i32
    %c0_i32_0 = arith.constant 0 : i32
    %c0_i32_1 = arith.constant 0 : i32
    return %c0_i32, %c0_i32_0 : i32, i32
  }
  func.func @transform_3(%arg0: i32) -> (i32, i32, i32) {
    %c0_i32 = arith.constant 0 : i32
    %c0_i32_0 = arith.constant 0 : i32
    %c0_i32_1 = arith.constant 0 : i32
    %c0_i32_2 = arith.constant 0 : i32
    return %c0_i32, %c0_i32_0, %c0_i32_1 : i32, i32, i32
  }
  func.func @transform_4(%arg0: i32) -> (i32, i32, i32) {
    %c0_i32 = arith.constant 0 : i32
    %c0_i32_0 = arith.constant 0 : i32
    %c0_i32_1 = arith.constant 0 : i32
    %c0_i32_2 = arith.constant 0 : i32
    return %c0_i32, %c0_i32_0, %c0_i32_1 : i32, i32, i32
  }
  func.func @transform_5(%arg0: i32) -> (i32, i32) {
    %c0_i32 = arith.constant 0 : i32
    %c0_i32_0 = arith.constant 0 : i32
    %c0_i32_1 = arith.constant 0 : i32
    return %c0_i32, %c0_i32_0 : i32, i32
  }
  func.func @transform_6(%arg0: i32) -> (i32, i32) {
    %c0_i32 = arith.constant 0 : i32
    %c0_i32_0 = arith.constant 0 : i32
    %c0_i32_1 = arith.constant 0 : i32
    return %c0_i32, %c0_i32_0 : i32, i32
  }
  func.func @transform_7(%arg0: i32) -> (i32, i32) {
    %c0_i32 = arith.constant 0 : i32
    %c0_i32_0 = arith.constant 0 : i32
    return %arg0, %c0_i32 : i32, i32
  }
}

</mosaic_0001>

<bundles_post_ra>
// kernel: tpu_custom_call.1
= control target key start
LH: loop header
LB: loop body
LE: loop exit
PB: predicated region body
PF: predicated region fallthrough
CT: control target
= control target key end

     0   :  { %12 = vsyncpa [#allocation3], 0  ;;  %s652_s24 = smov [#allocation2]   ;;  %s777_s0 = inlined_call_operand.vmem [shape: f32[16,8], index: 0, kind: input, shape index: {}]   ;;  %s778_s1 = inlined_call_operand.vmem [shape: f32[8,128], index: 1, kind: input, shape index: {}]   ;;  %s779_s2 = inlined_call_operand.vmem [shape: f32[1,128], index: 2, kind: input, shape index: {}]   ;;  %s780_s3 = inlined_call_operand.hbm [shape: f32[2,128,128], index: 3, kind: input, shape index: {}]   ;;  %s781_s4 = inlined_call_operand.vmem [shape: f32[2,1,128], index: 4, kind: input, shape index: {}]   ;;  %s782_s5 = inlined_call_operand.vmem [shape: f32[128,8], index: 5, kind: input, shape index: {}]   ;;  %s783_s6 = inlined_call_operand.vmem [shape: f32[1,8], index: 6, kind: input, shape index: {}]   ;;  %s784_s7 = inlined_call_operand.vmem [shape: f32[16,8], index: 7, kind: output, shape index: {}]  }
   0x1   :  { %s24_s25 = sshll.u32 %s652_s24, 4  ;;  %s25_s25 = int_to_ptr.vmem [resolvable:$true] %s24_s25 }
   0x2   :  { %s638_s26 = scalar_lea.vmem %s25_s25, 4096  ;;  %p643_p1 = scmp.lt.s32.totalorder %s25_s25, %s25_s25 }
   0x3   :  { %p639_p0 = scmp.ne.s32.totalorder %s25_s25, %s638_s26  ;;  %p644_p2 = scmp.lt.s32.totalorder %s638_s26, %s638_s26 }
   0x5   :  { %p645_p3 = por %p644_p2, %p643_p1 }
   0x7   :  { %p646_p4 = pnand %p645_p3, %p639_p0 }
   0x9   :  { %649 = shalt.err (!%p646_p4)
}
   0xa   :  { %s653_s27 = smov 128   ;;  %s654_s28 = smov 8  }
   0xb   :  { %30 = dma.hbm_to_vmem [thread:$0]  %s780_s3, 4096, %s25_s25, [#allocation3], %s653_s27, %s653_s27, %s654_s28  }
   0xc   :  { %650 = dma.done.wait [#allocation3], 4096  }
   0xd   :  { %651 = vsyncadd [#allocation3], 4294963200  ;;  %vm50_vm0 = vcmask 64512   ;;  %v42_v0 = vld [vmem:[%s778_s1] sm:$0xff]  ;;  %v41_v2 = vld [vmem:[%s777_s0 + $0x8] sm:$0xff] }
   0xe   :  { %v40_v1 = vld [vmem:[%s777_s0] sm:$0xff]  ;;  %505 = vmatprep.subr.mxu0 %v42_v0  ;;  %v149_v3 = vld [vmem:[#allocation2 + $0x78] sm:$0xff]  ;;  %v148_v4 = vld [vmem:[#allocation2 + $0x70] sm:$0xff] }
   0xf   :  { %507 = vmatprep.mubr.msk.f32.mxu0 %vm50_vm0, %v40_v1  ;;  %506 = vmatpush3.msra.mxu0 %v42_v0  ;;  %v147_v5 = vld [vmem:[#allocation2 + $0x68] sm:$0xff]  ;;  %v146_v6 = vld [vmem:[#allocation2 + $0x60] sm:$0xff]  ;;  %v145_v7 = vld [vmem:[#allocation2 + $0x58] sm:$0xff] }
  0x10   :  { %510 = vmatprep.subr.mxu1 %v149_v3  ;;  %508 = vmatmul.mubr.msk.f32.vlgmr.msra.gmra.mxu0 %vm50_vm0, %v41_v2  ;;  %v144_v8 = vld [vmem:[#allocation2 + $0x50] sm:$0xff]  ;;  %v143_v9 = vld [vmem:[#allocation2 + $0x48] sm:$0xff]  ;;  %v142_v10 = vld [vmem:[#allocation2 + $0x40] sm:$0xff] }
  0x11   :  { %511 = vmatpush3.msra.mxu1 %v149_v3  ;;  %v141_v11 = vld [vmem:[#allocation2 + $0x38] sm:$0xff]  ;;  %v140_v12 = vld [vmem:[#allocation2 + $0x30] sm:$0xff]  ;;  %v139_v13 = vld [vmem:[#allocation2 + $0x28] sm:$0xff] }
  0x12   :  { %512 = vmatprep.subr.mxu1 %v148_v4  ;;  %v138_v14 = vld [vmem:[#allocation2 + $0x20] sm:$0xff]  ;;  %v137_v15 = vld [vmem:[#allocation2 + $0x18] sm:$0xff]  ;;  %v136_v16 = vld [vmem:[#allocation2 + $0x10] sm:$0xff] }
  0x13   :  { %513 = vmatpush3.msra.mxu1 %v148_v4  ;;  %v135_v17 = vld [vmem:[#allocation2 + $0x8] sm:$0xff]  ;;  %v134_v18 = vld [vmem:[#allocation2] sm:$0xff]  ;;  %v250_v19 = vld [vmem:[#allocation2 + $0xf8] sm:$0xff] }
  0x14   :  { %514 = vmatprep.subr.mxu1 %v147_v5  ;;  %v249_v20 = vld [vmem:[#allocation2 + $0xf0] sm:$0xff]  ;;  %545 = vmatprep.subr.mxu0 %v250_v19  ;;  %v248_v21 = vld [vmem:[#allocation2 + $0xe8] sm:$0xff]  ;;  %v247_v22 = vld [vmem:[#allocation2 + $0xe0] sm:$0xff] }
  0x15   :  { %515 = vmatpush3.msra.mxu1 %v147_v5  ;;  %546 = vmatpush3.msra.mxu0 %v250_v19  ;;  %v246_v23 = vld [vmem:[#allocation2 + $0xd8] sm:$0xff]  ;;  %v245_v24 = vld [vmem:[#allocation2 + $0xd0] sm:$0xff]  ;;  %v441_v25 = vld [vmem:[%s779_s2] ss:$0 sm:$0xff] }
  0x16   :  { %516 = vmatprep.subr.mxu1 %v146_v6  ;;  %547 = vmatprep.subr.mxu0 %v249_v20  ;;  %v244_v32 = vld [vmem:[#allocation2 + $0xc8] sm:$0xff]  ;;  %v243_v33 = vld [vmem:[#allocation2 + $0xc0] sm:$0xff]  ;;  %v242_v34 = vld [vmem:[#allocation2 + $0xb8] sm:$0xff] }
  0x17   :  { %517 = vmatpush3.msra.mxu1 %v146_v6  ;;  %548 = vmatpush3.msra.mxu0 %v249_v20  ;;  %v241_v35 = vld [vmem:[#allocation2 + $0xb0] sm:$0xff]  ;;  %v240_v36 = vld [vmem:[#allocation2 + $0xa8] sm:$0xff]  ;;  %v239_v37 = vld [vmem:[#allocation2 + $0xa0] sm:$0xff] }
  0x18   :  { %518 = vmatprep.subr.mxu1 %v145_v7  ;;  %549 = vmatprep.subr.mxu0 %v248_v21  ;;  %v238_v38 = vld [vmem:[#allocation2 + $0x98] sm:$0xff]  ;;  %v237_v39 = vld [vmem:[#allocation2 + $0x90] sm:$0xff]  ;;  %v236_v40 = vld [vmem:[#allocation2 + $0x88] sm:$0xff] }
  0x19   :  { %519 = vmatpush3.msra.mxu1 %v145_v7  ;;  %550 = vmatpush3.msra.mxu0 %v248_v21  ;;  %v235_v41 = vld [vmem:[#allocation2 + $0x80] sm:$0xff]  ;;  %v351_v42 = vld [vmem:[%s782_s5 + $0x78] sm:$0xff]  ;;  %v350_v43 = vld [vmem:[%s782_s5 + $0x70] sm:$0xff] }
  0x1a   :  { %520 = vmatprep.subr.mxu1 %v144_v8  ;;  %551 = vmatprep.subr.mxu0 %v247_v22  ;;  %v349_v44 = vld [vmem:[%s782_s5 + $0x68] sm:$0xff]  ;;  %v348_v45 = vld [vmem:[%s782_s5 + $0x60] sm:$0xff]  ;;  %v347_v46 = vld [vmem:[%s782_s5 + $0x58] sm:$0xff] }
  0x1b   :  { %521 = vmatpush3.msra.mxu1 %v144_v8  ;;  %552 = vmatpush3.msra.mxu0 %v247_v22  ;;  %v346_v47 = vld [vmem:[%s782_s5 + $0x50] sm:$0xff]  ;;  %v444_v48 = vld [vmem:[%s781_s4] ss:$0 sm:$0xff]  ;;  %v345_v55 = vld [vmem:[%s782_s5 + $0x48] sm:$0xff] }
  0x1c   :  { %522 = vmatprep.subr.mxu1 %v143_v9  ;;  %553 = vmatprep.subr.mxu0 %v246_v23  ;;  %v344_v56 = vld [vmem:[%s782_s5 + $0x40] sm:$0xff]  ;;  %v343_v57 = vld [vmem:[%s782_s5 + $0x38] sm:$0xff]  ;;  %v342_v58 = vld [vmem:[%s782_s5 + $0x30] sm:$0xff] }
  0x1d   :  { %523 = vmatpush3.msra.mxu1 %v143_v9  ;;  %554 = vmatpush3.msra.mxu0 %v246_v23  ;;  %v341_v59 = vld [vmem:[%s782_s5 + $0x28] sm:$0xff]  ;;  %v340_v60 = vld [vmem:[%s782_s5 + $0x20] sm:$0xff]  ;;  %v339_v61 = vld [vmem:[%s782_s5 + $0x18] sm:$0xff] }
  0x1e   :  { %524 = vmatprep.subr.mxu1 %v142_v10  ;;  %555 = vmatprep.subr.mxu0 %v245_v24  ;;  %v338_v62 = vld [vmem:[%s782_s5 + $0x10] sm:$0xff]  ;;  %v337_v63 = vld [vmem:[%s782_s5 + $0x8] sm:$0xff]  ;;  %v336_v0 = vld [vmem:[%s782_s5] sm:$0xff] }
  0x1f   :  { %525 = vmatpush3.msra.mxu1 %v142_v10  ;;  %556 = vmatpush3.msra.mxu0 %v245_v24  ;;  %v446_v1 = vld [vmem:[%s781_s4 + $0x1] ss:$0 sm:$0xff]  ;;  %v447_v8 = vld [vmem:[%s783_s6] ss:$0 sm:$0xff] }
  0x20   :  { %526 = vmatprep.subr.mxu1 %v141_v11  ;;  %557 = vmatprep.subr.mxu0 %v244_v32 }
  0x21   :  { %527 = vmatpush3.msra.mxu1 %v141_v11  ;;  %558 = vmatpush3.msra.mxu0 %v244_v32 }
  0x22   :  { %528 = vmatprep.subr.mxu1 %v140_v12  ;;  %559 = vmatprep.subr.mxu0 %v243_v33 }
  0x23   :  { %529 = vmatpush3.msra.mxu1 %v140_v12  ;;  %560 = vmatpush3.msra.mxu0 %v243_v33 }
  0x24   :  { %530 = vmatprep.subr.mxu1 %v139_v13  ;;  %561 = vmatprep.subr.mxu0 %v242_v34 }
  0x25   :  { %531 = vmatpush3.msra.mxu1 %v139_v13  ;;  %562 = vmatpush3.msra.mxu0 %v242_v34 }
  0x26   :  { %532 = vmatprep.subr.mxu1 %v138_v14  ;;  %563 = vmatprep.subr.mxu0 %v241_v35 }
  0x27   :  { %533 = vmatpush3.msra.mxu1 %v138_v14  ;;  %564 = vmatpush3.msra.mxu0 %v241_v35 }
  0x28   :  { %534 = vmatprep.subr.mxu1 %v137_v15  ;;  %565 = vmatprep.subr.mxu0 %v240_v36 }
  0x29   :  { %535 = vmatpush3.msra.mxu1 %v137_v15  ;;  %566 = vmatpush3.msra.mxu0 %v240_v36 }
  0x2a   :  { %536 = vmatprep.subr.mxu1 %v136_v16  ;;  %567 = vmatprep.subr.mxu0 %v239_v37 }
  0x2b   :  { %537 = vmatpush3.msra.mxu1 %v136_v16  ;;  %568 = vmatpush3.msra.mxu0 %v239_v37 }
  0x2c   :  { %538 = vmatprep.subr.mxu1 %v135_v17  ;;  %569 = vmatprep.subr.mxu0 %v238_v38 }
  0x2d   :  { %539 = vmatpush3.msra.mxu1 %v135_v17  ;;  %570 = vmatpush3.msra.mxu0 %v238_v38 }
  0x2e   :  { %540 = vmatprep.subr.mxu1 %v134_v18  ;;  %571 = vmatprep.subr.mxu0 %v237_v39 }
  0x2f   :  { %541 = vmatpush3.msra.mxu1 %v134_v18  ;;  %572 = vmatpush3.msra.mxu0 %v237_v39 }
  0x30   :  { %573 = vmatprep.subr.mxu0 %v236_v40  ;;  %580 = vmatprep.subr.mxu1 %v351_v42 }
  0x31   :  { %574 = vmatpush3.msra.mxu0 %v236_v40 }
  0x32   :  { %575 = vmatprep.subr.mxu0 %v235_v41 }
  0x33   :  { %576 = vmatpush3.msra.mxu0 %v235_v41 }
  0xd0   :  { %v509_v26 = vpop.f32.mrf.mxu0 }
  0xd1   :  { %v129_v27 = vadd.f32 %v509_v26, %v441_v25 }
  0xd2   :  { %v123_v28 = vpop.f32.mrf.mxu0 }
  0xd3   :  { %v124_v29 = vadd.f32 %v441_v25, %v123_v28 }
  0xd5   :  { %618 = vtanh.f32 %v124_v29 }
  0xd6   :  { %620 = vtanh.f32 %v129_v27 }
  0xe2   :  { %v619_v30 = vpop.eup %618 }
  0xe3   :  { %v621_v31 = vpop.eup %620  ;;  %542 = vmatprep.mubr.f32.mxu1 %v619_v30 }
  0xe4   :  { %543 = vmatmul.mubr.f32.vlgmr.msra.gmra.mxu1 %v621_v31 }
  0xe5   :  { %581 = vmatpush3.msra.mxu1 %v351_v42 }
  0xe6   :  { %582 = vmatprep.subr.mxu1 %v350_v43 }
  0xe7   :  { %583 = vmatpush3.msra.mxu1 %v350_v43 }
  0xe8   :  { %584 = vmatprep.subr.mxu1 %v349_v44 }
  0xe9   :  { %585 = vmatpush3.msra.mxu1 %v349_v44 }
  0xea   :  { %586 = vmatprep.subr.mxu1 %v348_v45 }
  0xeb   :  { %587 = vmatpush3.msra.mxu1 %v348_v45 }
  0xec   :  { %588 = vmatprep.subr.mxu1 %v347_v46 }
  0xed   :  { %589 = vmatpush3.msra.mxu1 %v347_v46 }
  0xee   :  { %590 = vmatprep.subr.mxu1 %v346_v47 }
  0xef   :  { %591 = vmatpush3.msra.mxu1 %v346_v47 }
  0xf0   :  { %592 = vmatprep.subr.mxu1 %v345_v55 }
  0xf1   :  { %593 = vmatpush3.msra.mxu1 %v345_v55 }
  0xf2   :  { %594 = vmatprep.subr.mxu1 %v344_v56 }
  0xf3   :  { %595 = vmatpush3.msra.mxu1 %v344_v56 }
  0xf4   :  { %596 = vmatprep.subr.mxu1 %v343_v57 }
  0xf5   :  { %597 = vmatpush3.msra.mxu1 %v343_v57 }
  0xf6   :  { %598 = vmatprep.subr.mxu1 %v342_v58 }
  0xf7   :  { %599 = vmatpush3.msra.mxu1 %v342_v58 }
  0xf8   :  { %600 = vmatprep.subr.mxu1 %v341_v59 }
  0xf9   :  { %601 = vmatpush3.msra.mxu1 %v341_v59 }
  0xfa   :  { %602 = vmatprep.subr.mxu1 %v340_v60 }
  0xfb   :  { %603 = vmatpush3.msra.mxu1 %v340_v60 }
  0xfc   :  { %604 = vmatprep.subr.mxu1 %v339_v61 }
  0xfd   :  { %605 = vmatpush3.msra.mxu1 %v339_v61 }
  0xfe   :  { %606 = vmatprep.subr.mxu1 %v338_v62 }
  0xff   :  { %607 = vmatpush3.msra.mxu1 %v338_v62 }
 0x100   :  { %608 = vmatprep.subr.mxu1 %v337_v63 }
 0x101   :  { %609 = vmatpush3.msra.mxu1 %v337_v63 }
 0x102   :  { %610 = vmatprep.subr.mxu1 %v336_v0 }
 0x103   :  { %611 = vmatpush3.msra.mxu1 %v336_v0 }
 0x1a4   :  { %v544_v49 = vpop.f32.mrf.mxu1 }
 0x1a5   :  { %v229_v50 = vadd.f32 %v544_v49, %v444_v48 }
 0x1a6   :  { %v223_v51 = vpop.f32.mrf.mxu1 }
 0x1a7   :  { %v224_v52 = vadd.f32 %v444_v48, %v223_v51 }
 0x1a9   :  { %622 = vtanh.f32 %v224_v52 }
 0x1aa   :  { %624 = vtanh.f32 %v229_v50 }
 0x1b6   :  { %v623_v53 = vpop.eup %622 }
 0x1b7   :  { %v625_v54 = vpop.eup %624  ;;  %577 = vmatprep.mubr.f32.mxu0 %v623_v53 }
 0x1b8   :  { %578 = vmatmul.mubr.f32.vlgmr.msra.gmra.mxu0 %v625_v54 }
 0x278   :  { %v579_v2 = vpop.f32.mrf.mxu0 }
 0x279   :  { %v331_v3 = vadd.f32 %v579_v2, %v446_v1 }
 0x27a   :  { %v325_v4 = vpop.f32.mrf.mxu0 }
 0x27b   :  { %v326_v5 = vadd.f32 %v446_v1, %v325_v4 }
 0x27d   :  { %626 = vtanh.f32 %v326_v5 }
 0x27e   :  { %628 = vtanh.f32 %v331_v3 }
 0x28a   :  { %v627_v6 = vpop.eup %626 }
 0x28b   :  { %v629_v7 = vpop.eup %628  ;;  %612 = vmatprep.mubr.f32.mxu1 %v627_v6 }
 0x28c   :  { %613 = vmatmul.mubr.f32.vlgmr.msra.gmra.mxu1 %v629_v7 }
 0x34c   :  { %v614_v9 = vpop.f32.mrf.mxu1 }
 0x34d   :  { %v431_v10 = vadd.f32 %v614_v9, %v447_v8 }
 0x34e   :  { %v425_v11 = vpop.f32.mrf.mxu1 }
 0x34f   :  { %435 = vst.msk [vmem:[%s784_s7 + $0x8] sm:$0xff] %vm50_vm0, %v431_v10  ;;  %v426_v12 = vadd.f32 %v447_v8, %v425_v11 }
 0x351   :  { %434 = vst.msk [vmem:[%s784_s7] sm:$0xff] %vm50_vm0, %v426_v12 }
 0x352   :  { %440 = vsyncpa [#allocation3], 1 }

</bundles_post_ra>
